<compile_context>
chip_gen: v7x
topology: tpu7x:2x2x1
jax: 0.10.0
libtpu: 0.0.40
codegen_flags: <defaults>
</compile_context>

<pallas_src>
import jax
import jax.numpy as jnp
from jax.experimental import pallas as pl
from jax.experimental.pallas import tpu as pltpu


def classifier_kernel(x_ref, w1_ref, b1_ref, w2_ref, b2_ref, out_ref):
    """One batch tile: log_softmax(tanh(x @ W1 + b1) @ W2 + b2).

    x_ref  : (TB, D)  f32  activation tile (pipelined across the batch grid)
    w1_ref : (D,  H)  f32  resident first-layer weights (raw-feature rows only)
    b1_ref : (1,  H)  f32  first bias with the broadcast `entity` term folded in
    w2_ref : (H,  O)  f32  resident second-layer weights
    b2_ref : (1,  O)  f32  second bias
    out_ref: (TB, O)  f32  log-probabilities (only the O real lanes are stored)
    """
    hi = jax.lax.Precision.HIGHEST  # kernel is DMA/overhead bound, not MXU bound

    # First matmul + bias + tanh, all f32 (VPU/EUP f32 path works on every gen).
    h = jnp.dot(x_ref[...], w1_ref[...],
                preferred_element_type=jnp.float32, precision=hi)
    h = jnp.tanh(h + b1_ref[...])

    # Second matmul + bias.
    logits = jnp.dot(h, w2_ref[...],
                     preferred_element_type=jnp.float32, precision=hi)
    logits = logits + b2_ref[...]

    # Numerically stable log-softmax over the feature (lane) axis.
    m = jnp.max(logits, axis=-1, keepdims=True)
    shifted = logits - m
    lse = jnp.log(jnp.sum(jnp.exp(shifted), axis=-1, keepdims=True))
    out_ref[...] = shifted - lse


def prepare_classifier_params(entity, w1, b1, w2, b2, num_raw_features):
    """One-time weight prep (hoisted out of the per-call forward).

    cat([inp, ent_row]) @ W1 == inp @ W1[:D] + ent_row @ W1[D:]   (same for all
    rows), so the entity contribution is folded into an effective first bias
    and the kernel never sees the concatenated (B, input_size) tensor.
    """
    f32 = jnp.float32
    D = num_raw_features
    input_size, H = w1.shape
    E = input_size - D
    O = w2.shape[1]

    ent = entity.reshape(1, E).astype(f32)
    b1_eff = b1.reshape(1, H).astype(f32) + ent @ w1[D:, :].astype(f32)

    return (
        w1[:D, :].astype(f32),          # (D, H)
        b1_eff,                          # (1, H)
        w2.astype(f32),                  # (H, O)
        b2.reshape(1, O).astype(f32),    # (1, O)
    )


def classifier_forward(inp, params, *, block_b=1024):
    """Mirrors Classifier.forward(input, entity) given prepared params.

    inp    : (B, D) f32 raw features (entity term already folded into b1).
    params : (w1_top, b1_eff, w2, b2) from prepare_classifier_params.
    """
    w1_top, b1_eff, w2, b2 = params
    B, D = inp.shape
    H = w1_top.shape[1]
    O = w2.shape[1]
    f32 = jnp.float32

    # Batch tile: full extent for small batches (always a legal block), else a
    # large multiple-of-8 tile so the grid pipelines x/out while the (tiny)
    # weights stay VMEM-resident (same block every step).
    TB = B if B <= block_b else block_b
    grid = (pl.cdiv(B, TB),)

    return pl.pallas_call(
        classifier_kernel,
        out_shape=jax.ShapeDtypeStruct((B, O), f32),
        grid=grid,
        in_specs=[
            pl.BlockSpec((TB, D), lambda i: (i, 0)),   # streamed activations
            pl.BlockSpec((D, H), lambda i: (0, 0)),    # resident weights
            pl.BlockSpec((1, H), lambda i: (0, 0)),
            pl.BlockSpec((H, O), lambda i: (0, 0)),
            pl.BlockSpec((1, O), lambda i: (0, 0)),
        ],
        out_specs=pl.BlockSpec((TB, O), lambda i: (i, 0)),
        compiler_params=pltpu.CompilerParams(
            # Independent batch tiles.  (v7x: use CORE_PARALLEL / core_map if
            # profiling shows a single TensorCore doing all the work.)
            dimension_semantics=("parallel",),
        ),
    )(inp.astype(f32), w1_top, b1_eff, w2, b2)


def _reference_forward(inp, entity, w1, b1, w2, b2):
    hi = jax.lax.Precision.HIGHEST
    B = inp.shape[0]
    ent = jnp.broadcast_to(entity.reshape(1, -1), (B, entity.shape[-1]))
    x = jnp.concatenate([inp, ent], axis=1)
    h = jnp.tanh(jnp.dot(x, w1, precision=hi) + b1.reshape(1, -1))
    logits = jnp.dot(h, w2, precision=hi) + b2.reshape(1, -1)
    return jax.nn.log_softmax(logits, axis=1)


if __name__ == "__main__":
    # Small shapes consistent with the module:
    #   input  : (B, D)   raw features
    #   entity : (1, E)   single entity row, tiled to every batch element
    #   input_size = D + E (what the first Linear actually sees)
    B, D, E = 2, 24, 8
    input_size = D + E          # 32
    hidden_size = 32
    output_size = 8

    key = jax.random.PRNGKey(0)
    k_in, k_ent, k_w1, k_b1, k_w2, k_b2, k_big = jax.random.split(key, 7)

    inp = jax.random.normal(k_in, (B, D), dtype=jnp.float32)
    entity = jax.random.normal(k_ent, (1, E), dtype=jnp.float32)

    # PyTorch-style uniform(-1/sqrt(fan_in), 1/sqrt(fan_in)) init, [in, out].
    bound1 = 1.0 / (input_size ** 0.5)
    w1 = jax.random.uniform(k_w1, (input_size, hidden_size), jnp.float32,
                            -bound1, bound1)
    b1 = jax.random.uniform(k_b1, (1, hidden_size), jnp.float32, -bound1, bound1)

    bound2 = 1.0 / (hidden_size ** 0.5)
    w2 = jax.random.uniform(k_w2, (hidden_size, output_size), jnp.float32,
                            -bound2, bound2)
    b2 = jax.random.uniform(k_b2, (1, output_size), jnp.float32, -bound2, bound2)

    # Weight prep done ONCE (not per forward call).
    params = jax.block_until_ready(
        prepare_classifier_params(entity, w1, b1, w2, b2, num_raw_features=D))

    # --- small demo batch ----------------------------------------------------
    out = jax.block_until_ready(classifier_forward(inp, params))
    ref = _reference_forward(inp, entity, w1, b1, w2, b2)
    assert out.shape == (B, output_size)
    assert jnp.allclose(out, ref, atol=1e-4, rtol=1e-4), (
        float(jnp.max(jnp.abs(out - ref))))

    # --- larger batch with a small explicit tile: exercises the multi-tile
    #     pipelined path (grid=3) including a partial final block.
    B2 = 300
    inp_big = jax.random.normal(k_big, (B2, D), dtype=jnp.float32)
    out_big = jax.block_until_ready(
        classifier_forward(inp_big, params, block_b=128))
    ref_big = _reference_forward(inp_big, entity, w1, b1, w2, b2)
    assert out_big.shape == (B2, output_size)
    assert jnp.allclose(out_big, ref_big, atol=1e-4, rtol=1e-4), (
        float(jnp.max(jnp.abs(out_big - ref_big))))

    print("KERNEL_OK")
</pallas_src>

<mosaic_0001>
module attributes {stable_mosaic.version = 11 : i64} {
  func.func @classifier_kernel(%arg0: i32, %arg1: memref<2x24xf32, #tpu.memory_space<vmem>>, %arg2: memref<24x32xf32, #tpu.memory_space<vmem>>, %arg3: memref<1x32xf32, #tpu.memory_space<vmem>>, %arg4: memref<32x8xf32, #tpu.memory_space<vmem>>, %arg5: memref<1x8xf32, #tpu.memory_space<vmem>>, %arg6: memref<2x8xf32, #tpu.memory_space<vmem>>) attributes {dimension_semantics = [#tpu.dimension_semantics<parallel>], iteration_bounds = array<i64: 1>, scalar_prefetch = 0 : i64, scratch_operands = 0 : i64, tpu.core_type = #tpu.core_type<tc>, window_params = [{transform_indices = @transform_0, window_bounds = array<i64: 2, 24>}, {pipeline_mode = #tpu.pipeline_mode<synchronous>, transform_indices = @transform_1, window_bounds = array<i64: 24, 32>}, {pipeline_mode = #tpu.pipeline_mode<synchronous>, transform_indices = @transform_2, window_bounds = array<i64: 1, 32>}, {pipeline_mode = #tpu.pipeline_mode<synchronous>, transform_indices = @transform_3, window_bounds = array<i64: 32, 8>}, {pipeline_mode = #tpu.pipeline_mode<synchronous>, transform_indices = @transform_4, window_bounds = array<i64: 1, 8>}, {transform_indices = @transform_5, window_bounds = array<i64: 2, 8>}]} {
    %c0 = arith.constant 0 : index
    %c0_0 = arith.constant 0 : index
    %0 = vector.load %arg1[%c0, %c0_0] : memref<2x24xf32, #tpu.memory_space<vmem>>, vector<2x24xf32>
    %c0_1 = arith.constant 0 : index
    %c0_2 = arith.constant 0 : index
    %1 = vector.load %arg2[%c0_1, %c0_2] : memref<24x32xf32, #tpu.memory_space<vmem>>, vector<24x32xf32>
    %cst = arith.constant dense<0.000000e+00> : vector<2x32xf32>
    %2 = tpu.matmul %0, %1, %cst {dimension_numbers = #tpu.dot_dimension_numbers<[1], [0], [0], [1], [0, 0, 1, 1], [], []>, precision = #tpu.contract_precision<fp32>} : vector<2x24xf32>, vector<24x32xf32>, vector<2x32xf32> -> vector<2x32xf32>
    %c0_3 = arith.constant 0 : index
    %c0_4 = arith.constant 0 : index
    %3 = vector.load %arg3[%c0_3, %c0_4] : memref<1x32xf32, #tpu.memory_space<vmem>>, vector<1x32xf32>
    %4 = vector.broadcast %3 : vector<1x32xf32> to vector<2x32xf32>
    %5 = arith.addf %2, %4 : vector<2x32xf32>
    %6 = math.tanh %5 : vector<2x32xf32>
    %c0_5 = arith.constant 0 : index
    %c0_6 = arith.constant 0 : index
    %7 = vector.load %arg4[%c0_5, %c0_6] : memref<32x8xf32, #tpu.memory_space<vmem>>, vector<32x8xf32>
    %cst_7 = arith.constant dense<0.000000e+00> : vector<2x8xf32>
    %8 = tpu.matmul %6, %7, %cst_7 {dimension_numbers = #tpu.dot_dimension_numbers<[1], [0], [0], [1], [0, 0, 1, 1], [], []>, precision = #tpu.contract_precision<fp32>} : vector<2x32xf32>, vector<32x8xf32>, vector<2x8xf32> -> vector<2x8xf32>
    %c0_8 = arith.constant 0 : index
    %c0_9 = arith.constant 0 : index
    %9 = vector.load %arg5[%c0_8, %c0_9] : memref<1x8xf32, #tpu.memory_space<vmem>>, vector<1x8xf32>
    %10 = vector.broadcast %9 : vector<1x8xf32> to vector<2x8xf32>
    %11 = arith.addf %8, %10 : vector<2x8xf32>
    %cst_10 = arith.constant dense<0xFF800000> : vector<2xf32>
    %12 = vector.multi_reduction <maximumf>, %11, %cst_10 [1] : vector<2x8xf32> to vector<2xf32>
    %13 = vector.shape_cast %12 : vector<2xf32> to vector<2x1xf32>
    %14 = vector.broadcast %13 : vector<2x1xf32> to vector<2x8xf32>
    %15 = arith.subf %11, %14 : vector<2x8xf32>
    %16 = math.exp %15 : vector<2x8xf32>
    %cst_11 = arith.constant dense<0.000000e+00> : vector<2xf32>
    %17 = vector.multi_reduction <add>, %16, %cst_11 [1] : vector<2x8xf32> to vector<2xf32>
    %18 = vector.shape_cast %17 : vector<2xf32> to vector<2x1xf32>
    %19 = math.log %18 : vector<2x1xf32>
    %20 = vector.broadcast %19 : vector<2x1xf32> to vector<2x8xf32>
    %21 = arith.subf %15, %20 : vector<2x8xf32>
    %c0_12 = arith.constant 0 : index
    %c0_13 = arith.constant 0 : index
    %22 = vector.load %arg6[%c0_12, %c0_13] : memref<2x8xf32, #tpu.memory_space<vmem>>, vector<2x8xf32>
    tpu.vector_store %arg6[%c0_12, %c0_13], %21 {strides = array<i32>} : memref<2x8xf32, #tpu.memory_space<vmem>>, vector<2x8xf32>,
    return
  }
  func.func @transform_0(%arg0: i32) -> (i32, i32) {
    %c0_i32 = arith.constant 0 : i32
    %c0_i32_0 = arith.constant 0 : i32
    return %arg0, %c0_i32 : i32, i32
  }
  func.func @transform_1(%arg0: i32) -> (i32, i32) {
    %c0_i32 = arith.constant 0 : i32
    %c0_i32_0 = arith.constant 0 : i32
    %c0_i32_1 = arith.constant 0 : i32
    return %c0_i32, %c0_i32_0 : i32, i32
  }
  func.func @transform_2(%arg0: i32) -> (i32, i32) {
    %c0_i32 = arith.constant 0 : i32
    %c0_i32_0 = arith.constant 0 : i32
    %c0_i32_1 = arith.constant 0 : i32
    return %c0_i32, %c0_i32_0 : i32, i32
  }
  func.func @transform_3(%arg0: i32) -> (i32, i32) {
    %c0_i32 = arith.constant 0 : i32
    %c0_i32_0 = arith.constant 0 : i32
    %c0_i32_1 = arith.constant 0 : i32
    return %c0_i32, %c0_i32_0 : i32, i32
  }
  func.func @transform_4(%arg0: i32) -> (i32, i32) {
    %c0_i32 = arith.constant 0 : i32
    %c0_i32_0 = arith.constant 0 : i32
    %c0_i32_1 = arith.constant 0 : i32
    return %c0_i32, %c0_i32_0 : i32, i32
  }
  func.func @transform_5(%arg0: i32) -> (i32, i32) {
    %c0_i32 = arith.constant 0 : i32
    %c0_i32_0 = arith.constant 0 : i32
    return %arg0, %c0_i32 : i32, i32
  }
}

</mosaic_0001>

<bundles_post_ra>
// kernel: tpu_custom_call.1
= control target key start
LH: loop header
LB: loop body
LE: loop exit
PB: predicated region body
PF: predicated region fallthrough
CT: control target
= control target key end

     0   :  { %v1322_v3 = vmov 0.0|0.0   ;;  %vm1323_vm0 = vmmov 0   ;;  %v1324_v7 = vmov 0.0   ;;  %vm32_vm1 = vcmask 195584   ;;  %s1449_s0 = inlined_call_operand.vmem [shape: f32[2,24], index: 0, kind: input, shape index: {}]   ;;  %s1450_s1 = inlined_call_operand.vmem [shape: f32[24,32], index: 1, kind: input, shape index: {}]   ;;  %s1451_s2 = inlined_call_operand.vmem [shape: f32[1,32], index: 2, kind: input, shape index: {}]   ;;  %s1452_s3 = inlined_call_operand.vmem [shape: f32[32,8], index: 3, kind: input, shape index: {}]   ;;  %s1453_s4 = inlined_call_operand.vmem [shape: f32[1,8], index: 4, kind: input, shape index: {}]   ;;  %s1454_s5 = inlined_call_operand.hbm [shape: f32[2,8], index: 5, kind: output, shape index: {}]  }
   0x1   :  { %v22_v0 = vld [vmem:[%s1450_s1] sm:$0xff]  ;;  %v23_v1 = vld [vmem:[%s1450_s1 + $0x8] sm:$0xff]  ;;  %v24_v2 = vld [vmem:[%s1450_s1 + $0x10] sm:$0xff]  ;;  %1213 = vmatprep.subr.bf16.mxu0 %v1322_v3  ;;  %1099 = vmatprep.mubr.msk.f32.mxu0 %vm1323_vm0, %v1324_v7 }
   0x2   :  { %v37_v4 = vand.u32 4294901760, %v22_v0  ;;  %v40_v5 = vand.u32 4294901760, %v23_v1  ;;  %v43_v6 = vand.u32 4294901760, %v24_v2  ;;  %v21_v8 = vld [vmem:[%s1449_s0] sm:$0x3]  ;;  %1237 = vmatprep.subr.bf16.mxu1 %v1322_v3  ;;  %1166 = vmatprep.mubr.msk.f32.mxu1 %vm1323_vm0, %v1324_v7 }
   0x3   :  { %v34_v9 = vsel %vm32_vm1, %v21_v8, 0 }
   0x4   :  { %10 = vsyncpa [#allocation3], 0  ;;  %v1214_v10 = vpack.c.bf16 %v40_v5, %v37_v4  ;;  %v116_v11 = vsub.f32 %v22_v0, %v37_v4  ;;  %v123_v12 = vsub.f32 %v23_v1, %v40_v5  ;;  %v130_v13 = vsub.f32 %v24_v2, %v43_v6  ;;  %v509_v31 = vld [vmem:[%s1452_s3] sm:$0xff]  ;;  %v510_v32 = vld [vmem:[%s1452_s3 + $0x8] sm:$0xff] }
   0x5   :  { %v104_v14 = vand.u32 4294901760, %v34_v9  ;;  %v525_v33 = vand.u32 4294901760, %v509_v31  ;;  %v528_v34 = vand.u32 4294901760, %v510_v32  ;;  %v511_v37 = vld [vmem:[%s1452_s3 + $0x10] sm:$0xff]  ;;  %v512_v38 = vld [vmem:[%s1452_s3 + $0x18] sm:$0xff]  ;;  %vm520_vm2 = vcmask 261120  }
   0x6   :  { %1215 = vmatpush3.bf16.msra.mxu0 %v1214_v10  ;;  %v117_v15 = vand.u32 4294901760, %v116_v11  ;;  %v124_v16 = vand.u32 4294901760, %v123_v12  ;;  %v131_v20 = vand.u32 4294901760, %v130_v13  ;;  %v1220_v29 = vpack.c.bf16 %v123_v12, %v116_v11  ;;  %v1037_v63 = vld [vmem:[%s1451_s2] ss:$0 sm:$0xff] }
   0x7   :  { %1097 = vmatprep.subr.mxu0 %v1324_v7  ;;  %v105_v17 = vsub.f32 %v34_v9, %v104_v14  ;;  %v605_v35 = vsub.f32 %v509_v31, %v525_v33  ;;  %v612_v36 = vsub.f32 %v510_v32, %v528_v34  ;;  %v531_v41 = vand.u32 4294901760, %v511_v37 }
   0x8   :  { %v118_v18 = vsub.f32 %v116_v11, %v117_v15  ;;  %v125_v19 = vsub.f32 %v123_v12, %v124_v16  ;;  %v132_v26 = vsub.f32 %v130_v13, %v131_v20  ;;  %v1226_v30 = vpack.c.bf16 %v124_v16, %v117_v15 }
   0x9   :  { %v106_v21 = vand.u32 4294901760, %v105_v17  ;;  %v606_v39 = vand.u32 4294901760, %v605_v35  ;;  %v613_v40 = vand.u32 4294901760, %v612_v36  ;;  %v534_v42 = vand.u32 4294901760, %v512_v38 }
   0xa   :  { %1098 = vmatpush3.msra.mxu0 %v43_v6  ;;  %v119_v22 = vand.u32 4294901760, %v118_v18  ;;  %v126_v23 = vand.u32 4294901760, %v125_v19  ;;  %v133_v28 = vand.u32 4294901760, %v132_v26  ;;  %v619_v45 = vsub.f32 %v511_v37, %v531_v41 }
   0xb   :  { %v107_v24 = vsub.f32 %v105_v17, %v106_v21  ;;  %1216 = vmatprep.subr.bf16.mxu0 %v1322_v3  ;;  %v607_v43 = vsub.f32 %v605_v35, %v606_v39  ;;  %v614_v44 = vsub.f32 %v612_v36, %v613_v40  ;;  %v626_v46 = vsub.f32 %v512_v38, %v534_v42 }
   0xc   :  { %v1217_v25 = vpack.c.bf16 %v126_v23, %v119_v22  ;;  %v620_v49 = vand.u32 4294901760, %v619_v45  ;;  %v1232_v57 = vpack.c.bf16 %v528_v34, %v525_v33  ;;  %v1244_v58 = vpack.c.bf16 %v612_v36, %v605_v35 }
   0xd   :  { %v108_v27 = vand.u32 4294901760, %v107_v24  ;;  %v608_v47 = vand.u32 4294901760, %v607_v43  ;;  %v615_v48 = vand.u32 4294901760, %v614_v44  ;;  %v627_v50 = vand.u32 4294901760, %v626_v46 }
   0xe   :  { %v621_v52 = vsub.f32 %v619_v45, %v620_v49  ;;  %v1235_v59 = vpack.c.bf16 %v534_v42, %v531_v41  ;;  %v1247_v60 = vpack.c.bf16 %v626_v46, %v619_v45  ;;  %v1256_v61 = vpack.c.bf16 %v613_v40, %v606_v39 }
   0xf   :  { %1100 = vmatmul.mubr.f32.vlgmr.msra.gmra.mrb[0].mxu0 %v108_v27  ;;  %v1238_v51 = vpack.c.bf16 %v615_v48, %v608_v47  ;;  %v628_v53 = vsub.f32 %v626_v46, %v627_v50  ;;  %v1259_v62 = vpack.c.bf16 %v627_v50, %v620_v49  ;;  %vm1009_vm3 = vcmask 58368  }
  0x10   :  { %1218 = vmatpush3.bf16.msra.mxu0 %v1217_v25  ;;  %1108 = vmatprep.mubr.msk.f32.mxu0 %vm1323_vm0, %v1324_v7  ;;  %v622_v54 = vand.u32 4294901760, %v621_v52 }
  0x11   :  { %1106 = vmatprep.subr.mxu0 %v1324_v7  ;;  %1239 = vmatpush3.bf16.msra.mxu1 %v1238_v51  ;;  %v629_v55 = vand.u32 4294901760, %v628_v53 }
  0x12   :  { %1240 = vmatprep.subr.bf16.mxu1 %v1322_v3 }
  0x13   :  { %v1241_v56 = vpack.c.bf16 %v629_v55, %v622_v54 }
  0x14   :  { %1107 = vmatpush3.msra.mxu0 %v133_v28 }
  0x15   :  { %1219 = vmatprep.subr.bf16.mxu0 %v1322_v3  ;;  %1242 = vmatpush3.bf16.msra.mxu1 %v1241_v56 }
  0x16   :  { %1243 = vmatprep.subr.bf16.mxu1 %v1322_v3 }
  0x17   :  { %1109 = vmatmul.mubr.f32.vlgmr.msra.gmra.mrb[0].mxu0 %v104_v14 }
  0x18   :  { %1221 = vmatpush3.bf16.msra.mxu0 %v1220_v29  ;;  %1117 = vmatprep.mubr.msk.f32.mxu0 %vm1323_vm0, %v1324_v7 }
  0x19   :  { %1115 = vmatprep.subr.mxu0 %v1324_v7 }
  0x1c   :  { %1116 = vmatpush3.msra.mxu0 %v130_v13 }
  0x1d   :  { %1222 = vmatprep.subr.bf16.mxu0 %v1322_v3 }
  0x1f   :  { %1118 = vmatmul.mubr.f32.vlgmr.msra.gmra.mrb[0].mxu0 %v105_v17 }
  0x20   :  { %1224 = vmatpush3.bf16.msra.mxu0 %v1214_v10  ;;  %1126 = vmatprep.mubr.msk.f32.mxu0 %vm1323_vm0, %v1324_v7 }
  0x21   :  { %1124 = vmatprep.subr.mxu0 %v1324_v7 }
  0x24   :  { %1125 = vmatpush3.msra.mxu0 %v43_v6 }
  0x25   :  { %1225 = vmatprep.subr.bf16.mxu0 %v1322_v3 }
  0x27   :  { %1127 = vmatmul.mubr.f32.vlgmr.msra.gmra.mrb[0].mxu0 %v106_v21 }
  0x28   :  { %1227 = vmatpush3.bf16.msra.mxu0 %v1226_v30  ;;  %1135 = vmatprep.mubr.msk.f32.mxu0 %vm1323_vm0, %v1324_v7 }
  0x29   :  { %1133 = vmatprep.subr.mxu0 %v1324_v7 }
  0x2c   :  { %1134 = vmatpush3.msra.mxu0 %v131_v20 }
  0x2d   :  { %1228 = vmatprep.subr.bf16.mxu0 %v1322_v3 }
  0x2f   :  { %1136 = vmatmul.mubr.f32.vlgmr.msra.gmra.mrb[0].mxu0 %v104_v14 }
  0x30   :  { %1230 = vmatpush3.bf16.msra.mxu0 %v1214_v10  ;;  %1144 = vmatprep.mubr.msk.f32.mxu0 %vm1323_vm0, %v1324_v7 }
  0x31   :  { %1142 = vmatprep.subr.mxu0 %v1324_v7 }
  0x34   :  { %1143 = vmatpush3.msra.mxu0 %v43_v6 }
  0x35   :  { %1231 = vmatprep.subr.bf16.mxu0 %v1322_v3 }
  0x37   :  { %1145 = vmatmul.mubr.f32.vlgmr.msra.gmra.mrb[0].mxu0 %v104_v14  ;;  %v1038_v14 = vld [vmem:[%s1453_s4] ss:$0 sm:$0xff]  ;;  %s1325_s4 = smov [#allocation2]  }
  0x38   :  { %1155 = vmatprep.mubr.msk.f32.mxu0 %vm1323_vm0, %v1324_v7  ;;  %1233 = vmatpush3.bf16.msra.mxu0 %v1232_v57  ;;  %s1029_s9 = sshll.u32 %s1325_s4, 4  ;;  %s1030_s9 = int_to_ptr.vmem [resolvable:$true] %s1029_s9 }
  0x39   :  { %1234 = vmatprep.subr.bf16.mxu0 %v1322_v3  ;;  %s1298_s10 = scalar_lea.vmem %s1030_s9, 32  ;;  %p1303_p1 = scmp.lt.s32.totalorder %s1030_s9, %s1030_s9 }
  0x3a   :  { %p1299_p0 = scmp.ne.s32.totalorder %s1030_s9, %s1298_s10  ;;  %p1304_p2 = scmp.lt.s32.totalorder %s1298_s10, %s1298_s10 }
  0x3c   :  { %1236 = vmatpush3.bf16.msra.mxu0 %v1235_v59  ;;  %p1305_p3 = por %p1304_p2, %p1303_p1 }
  0x3e   :  { %p1306_p4 = pnand %p1305_p3, %p1299_p0 }
 0x10a   :  { %v504_v0 = vpop.f32.mrb[0].mxu0 }
 0x10b   :  { %v1267_v1 = vadd.f32 %v1037_v63, %v504_v0  ;;  %v1146_v2 = vpop.f32.mrb[1].mxu0 }
 0x10d   :  { %1292 = vtanh.f32 %v1267_v1 }
 0x117   :  { %v1293_v4 = vpop.eup %1292 }
 0x118   :  { %v522_v5 = vsel %vm520_vm2, %v1293_v4, 0 }
 0x119   :  { %v593_v6 = vand.u32 4294901760, %v522_v5 }
 0x11b   :  { %v594_v8 = vsub.f32 %v522_v5, %v593_v6  ;;  %1167 = vmatmul.mubr.f32.vlgmr.msra.gmra.mrb[0].mxu1 %v593_v6 }
 0x11c   :  { %1245 = vmatpush3.bf16.msra.mxu1 %v1244_v58  ;;  %1177 = vmatprep.mubr.msk.f32.mxu1 %vm1323_vm0, %v1324_v7 }
 0x11d   :  { %1246 = vmatprep.subr.bf16.mxu1 %v1322_v3  ;;  %v595_v9 = vand.u32 4294901760, %v594_v8 }
 0x11f   :  { %v596_v10 = vsub.f32 %v594_v8, %v595_v9 }
 0x120   :  { %1248 = vmatpush3.bf16.msra.mxu1 %v1247_v60 }
 0x121   :  { %v597_v11 = vand.u32 4294901760, %v596_v10  ;;  %1249 = vmatprep.subr.bf16.mxu1 %v1322_v3 }
 0x123   :  { %1156 = vmatmul.mubr.f32.vlgmr.msra.gmra.mrb[2].mxu0 %v597_v11  ;;  %1178 = vmatmul.mubr.f32.vlgmr.msra.gmra.mrb[0].mxu1 %v594_v8 }
 0x124   :  { %1251 = vmatpush3.bf16.msra.mxu1 %v1232_v57  ;;  %1188 = vmatprep.mubr.msk.f32.mxu1 %vm1323_vm0, %v1324_v7 }
 0x125   :  { %1252 = vmatprep.subr.bf16.mxu1 %v1322_v3 }
 0x128   :  { %1254 = vmatpush3.bf16.msra.mxu1 %v1235_v59 }
 0x129   :  { %1255 = vmatprep.subr.bf16.mxu1 %v1322_v3 }
 0x12b   :  { %1189 = vmatmul.mubr.f32.vlgmr.msra.gmra.mrb[0].mxu1 %v595_v9 }
 0x12c   :  { %1257 = vmatpush3.bf16.msra.mxu1 %v1256_v61  ;;  %1199 = vmatprep.mubr.msk.f32.mxu1 %vm1323_vm0, %v1324_v7 }
 0x12d   :  { %1258 = vmatprep.subr.bf16.mxu1 %v1322_v3 }
 0x130   :  { %1260 = vmatpush3.bf16.msra.mxu1 %v1259_v62 }
 0x131   :  { %1261 = vmatprep.subr.bf16.mxu1 %v1322_v3 }
 0x133   :  { %1200 = vmatmul.mubr.f32.vlgmr.msra.gmra.mrb[0].mxu1 %v593_v6 }
 0x134   :  { %1263 = vmatpush3.bf16.msra.mxu1 %v1232_v57  ;;  %1210 = vmatprep.mubr.msk.f32.mxu1 %vm1323_vm0, %v1324_v7 }
 0x135   :  { %1264 = vmatprep.subr.bf16.mxu1 %v1322_v3 }
 0x138   :  { %1266 = vmatpush3.bf16.msra.mxu1 %v1235_v59 }
 0x13b   :  { %1211 = vmatmul.mubr.f32.vlgmr.msra.gmra.mrb[0].mxu1 %v593_v6 }
 0x1f6   :  { %v599_v12 = vpop.f32.mrb[2].mxu0 }
 0x1f7   :  { %v1157_v13 = vpop.f32.mrb[3].mxu0  ;;  %v600_v15 = vadd.f32 %v1038_v14, %v599_v12 }
 0x20e   :  { %v1005_v16 = vpop.f32.mrb[0].mxu1 }
 0x20f   :  { %v1269_v17 = vadd.f32 %v1005_v16, %v600_v15  ;;  %v1212_v18 = vpop.f32.mrb[1].mxu1 }
 0x211   :  { %v1010_v19 = vsel %vm1009_vm3, %v1269_v17, -inf }
 0x212   :  { %1011 = vmax.xlane.f32.xlu0 %v1010_v19 }
 0x29f   :  { %v1012_v20 = vpop.xlane.xlu0 %1011 }
 0x2a0   :  { %v1013_v7 = vsub.f32 %v1269_v17, %v1012_v20 }
 0x2a2   :  { %v1014_v21 = vmul.f32 1.442695, %v1013_v7 }
 0x2a4   :  { %1294 = vpow2.f32 %v1014_v21 }
 0x2ae   :  { %v1295_v3 = vpop.eup %1294 }
 0x2af   :  { %v1016_v22 = vsel %vm1009_vm3, %v1295_v3, 0.0 }
 0x2b0   :  { %1017 = vadd.xlane.f32.xlu0 %v1016_v22 }
 0x33d   :  { %v1018_v23 = vpop.xlane.xlu0 %1017 }
 0x33e   :  { %1296 = vlog2.f32 %v1018_v23 }
 0x348   :  { %v1297_v24 = vpop.eup %1296 }
 0x349   :  { %v1020_v25 = vmul.f32 0.6931472, %v1297_v24 }
 0x34b   :  { %v1021_v26 = vsub.f32 %v1013_v7, %v1020_v25 }
 0x34d   :  { %1022 = vst.msk [vmem:[#allocation2] sm:$0x3] %vm1009_vm3, %v1021_v26 }
 0x34e   :  { %1309 = shalt.err (!%p1306_p4)
}
 0x34f   :  { %s1310_s13 = scalar_lea.hbm %s1454_s5, 32 }
 0x350   :  { %p1311_p5 = scmp.ne.s32.totalorder %s1454_s5, %s1310_s13  ;;  %p1314_p6 = scmp.lt.u32.totalorder %s1310_s13, %s1454_s5 }
 0x352   :  { %p1316_p7 = pnand %p1314_p6, %p1311_p5 }
 0x354   :  { %1319 = shalt.err (!%p1316_p7)
}
 0x355   :  { %1032 = dma.vmem_to_hbm [thread:$0]  %s1030_s9, 32, %s1454_s5, [#allocation3]  }
 0x356   :  { %1320 = dma.done.wait [#allocation3], 32  }
 0x357   :  { %1321 = vsyncadd [#allocation3], 4294967264 }
 0x358   :  { %1036 = vsyncpa [#allocation3], 1 }

</bundles_post_ra>
